<compile_context>
chip_gen: v7x
topology: tpu7x:2x2x1
jax: 0.10.0
libtpu: 0.0.40
codegen_flags: <defaults>
</compile_context>

<pallas_src>
import functools

import jax
import jax.numpy as jnp
import numpy as np
from jax.experimental import pallas as pl
from jax.experimental.pallas import tpu as pltpu


# ----------------------------------------------------------------------------
# Path 1: nn.Identity forward -- nothing to do at all.
# ----------------------------------------------------------------------------
def identity(x: jax.Array) -> jax.Array:
    """Identity.forward(x): return x unchanged (no kernel, zero HBM traffic)."""
    return x


# ----------------------------------------------------------------------------
# Path 2: zero-copy Pallas identity via output/input buffer aliasing.
# The input is donated at the jit boundary (donate_argnums=0); without donation
# XLA would insert a defensive full HBM->HBM copy to satisfy the alias.
# After calling this, the caller must not reuse `x` on device.
# ----------------------------------------------------------------------------
def _alias_kernel(x_hbm_ref, o_hbm_ref):
    # Output buffer aliases the (donated) input buffer: no compute, no DMA.
    del x_hbm_ref, o_hbm_ref


@functools.partial(jax.jit, donate_argnums=0)
def identity_donated(x: jax.Array) -> jax.Array:
    return pl.pallas_call(
        _alias_kernel,
        out_shape=jax.ShapeDtypeStruct(x.shape, x.dtype),
        in_specs=[pl.BlockSpec(memory_space=pl.ANY)],
        out_specs=pl.BlockSpec(memory_space=pl.ANY),
        input_output_aliases={0: 0},
    )(x)


# ----------------------------------------------------------------------------
# Path 3: materialized copy into a fresh buffer -- direct HBM->HBM DMA.
# ----------------------------------------------------------------------------
_CHUNK_SPLIT_BYTES = 256 * 1024  # split into multiple in-flight DMAs above this
_MAX_CHUNKS = 4                  # 2-4 chunks in flight keeps DMA engines busy


def _chunk_bounds(dim0: int, num_chunks: int):
    """Split [0, dim0) into <= num_chunks contiguous (offset, size) chunks."""
    base, rem = divmod(dim0, num_chunks)
    bounds, off = [], 0
    for j in range(num_chunks):
        sz = base + (1 if j < rem else 0)
        if sz > 0:
            bounds.append((off, sz))
            off += sz
    return bounds


def identity_copy(x: jax.Array) -> jax.Array:
    """Identity that materializes a new output buffer (HBM->HBM DMA copy)."""
    if x.size == 0:
        return x

    nbytes = x.size * x.dtype.itemsize
    if x.ndim >= 1 and x.shape[0] >= 2 and nbytes >= _CHUNK_SPLIT_BYTES:
        bounds = _chunk_bounds(x.shape[0], min(_MAX_CHUNKS, x.shape[0]))
    else:
        bounds = None  # single whole-array DMA (covers scalars / tiny inputs)

    num_sems = len(bounds) if bounds is not None else 1

    def _dma_copy_kernel(x_hbm, o_hbm, sems):
        if bounds is None:
            copies = [pltpu.make_async_copy(x_hbm, o_hbm, sems.at[0])]
        else:
            copies = [
                pltpu.make_async_copy(
                    x_hbm.at[pl.ds(off, sz)],
                    o_hbm.at[pl.ds(off, sz)],
                    sems.at[j],
                )
                for j, (off, sz) in enumerate(bounds)
            ]
        for cp in copies:   # issue all DMAs -> multiple copies in flight
            cp.start()
        for cp in copies:   # then wait for all of them
            cp.wait()

    return pl.pallas_call(
        _dma_copy_kernel,
        out_shape=jax.ShapeDtypeStruct(x.shape, x.dtype),
        in_specs=[pl.BlockSpec(memory_space=pl.ANY)],
        out_specs=pl.BlockSpec(memory_space=pl.ANY),
        scratch_shapes=[pltpu.SemaphoreType.DMA((num_sems,))],
        cost_estimate=pl.CostEstimate(
            flops=0, transcendentals=0, bytes_accessed=2 * nbytes),
    )(x)


if __name__ == "__main__":
    key = jax.random.PRNGKey(0)

    # Small NCHW-style input: batch=2, channels=4, spatial=16x16.
    x = jax.random.normal(key, (2, 4, 16, 16), dtype=jnp.float32)
    expected = np.asarray(x)  # host copy BEFORE any donation of x

    # 1) Plain identity (no kernel launch).
    y_plain = identity(x)
    assert y_plain is x

    # 2) Materialized copy via direct HBM->HBM DMA (single-chunk path).
    y_copy = identity_copy(x)
    jax.block_until_ready(y_copy)
    assert y_copy.shape == expected.shape and y_copy.dtype == jnp.float32
    assert np.array_equal(np.asarray(y_copy), expected)
    assert np.array_equal(np.asarray(y_plain), expected)

    # 2b) Slightly larger input exercising the multi-chunk DMA path
    #     (4 DMAs in flight over the leading dim).
    x_big = jax.random.normal(jax.random.PRNGKey(1), (8, 128, 128),
                              dtype=jnp.float32)
    expected_big = np.asarray(x_big)
    y_big = identity_copy(x_big)
    jax.block_until_ready(y_big)
    assert np.array_equal(np.asarray(y_big), expected_big)

    # 3) Zero-copy aliased Pallas identity -- donates x, so call it LAST and
    #    do not touch x (or y_plain, which is x) on device afterwards.
    y_alias = identity_donated(x)
    jax.block_until_ready(y_alias)
    assert y_alias.shape == expected.shape and y_alias.dtype == jnp.float32
    assert np.array_equal(np.asarray(y_alias), expected)

    print("KERNEL_OK")
</pallas_src>

<mosaic_0001>
module attributes {stable_mosaic.version = 11 : i64} {
  func.func @_dma_copy_kernel(%arg0: memref<2x4x16x16xf32, #tpu.memory_space<any>>, %arg1: memref<2x4x16x16xf32, #tpu.memory_space<any>>, %arg2: memref<1x!tpu.dma_semaphore, #tpu.memory_space<semaphore_mem>>) attributes {dimension_semantics = [], scalar_prefetch = 0 : i64, scratch_operands = 1 : i64, tpu.core_type = #tpu.core_type<tc>} {
    %c0_i32 = arith.constant 0 : i32
    %0 = tpu.memref_slice %arg2[%c0_i32] : memref<1x!tpu.dma_semaphore, #tpu.memory_space<semaphore_mem>> -> memref<1x!tpu.dma_semaphore, #tpu.memory_space<semaphore_mem>>
    %1 = tpu.memref_squeeze %0 : memref<1x!tpu.dma_semaphore, #tpu.memory_space<semaphore_mem>> -> memref<!tpu.dma_semaphore, #tpu.memory_space<semaphore_mem>>
    tpu.enqueue_dma source(%arg0 : memref<2x4x16x16xf32, #tpu.memory_space<any>>) target(%arg1 : memref<2x4x16x16xf32, #tpu.memory_space<any>>) target_semaphore(%1 : memref<!tpu.dma_semaphore, #tpu.memory_space<semaphore_mem>>)
    %c0_i32_0 = arith.constant 0 : i32
    %2 = tpu.memref_slice %arg2[%c0_i32_0] : memref<1x!tpu.dma_semaphore, #tpu.memory_space<semaphore_mem>> -> memref<1x!tpu.dma_semaphore, #tpu.memory_space<semaphore_mem>>
    %3 = tpu.memref_squeeze %2 : memref<1x!tpu.dma_semaphore, #tpu.memory_space<semaphore_mem>> -> memref<!tpu.dma_semaphore, #tpu.memory_space<semaphore_mem>>
    tpu.wait_dma2 semaphore(%3 : memref<!tpu.dma_semaphore, #tpu.memory_space<semaphore_mem>>) src(%arg0 : memref<2x4x16x16xf32, #tpu.memory_space<any>>) dst(%arg1 : memref<2x4x16x16xf32, #tpu.memory_space<any>>)
    return
  }
}

</mosaic_0001>

<bundles_post_ra>
// kernel: tpu_custom_call.1
= control target key start
LH: loop header
LB: loop body
LE: loop exit
PB: predicated region body
PF: predicated region fallthrough
CT: control target
= control target key end

     0   :  { %s36_s6 = smov [#allocation2]   ;;  %s37_s7 = smov [#allocation3]   ;;  %s55_s0 = inlined_call_operand.hbm [shape: f32[2,4,16,16], index: 0, kind: input, shape index: {}]   ;;  %s56_s1 = inlined_call_operand.hbm [shape: f32[2,4,16,16], index: 1, kind: output, shape index: {}]  }
   0x1   :  { %s38_s8 = smov 0  }
   0x2   :  { %18 = dma.general %s55_s0, 2048, %s56_s1, %s36_s6, %s37_s7, [#allocation4], %s38_s8, 0  }
   0x3   :  { %34 = dma.done.wait [#allocation2], 2048 }
   0x4   :  { %35 = vsyncadd [#allocation2], 4294965248 }
   0x5   :  { %24 = vsyncmov [#allocation2] }
   0x8   :  { %s25_s13 = vpop.sfrf %24 }
   0x9   :  { %p30_p0 = scmp.ne.s32.totalorder %s25_s13, 0 }
   0xb   :  { %29 = shalt.err (%p30_p0)  }

</bundles_post_ra>
